<compile_context>
chip_gen: v7x
topology: tpu7x:2x2x1
jax: 0.10.0
libtpu: 0.0.40
codegen_flags: <defaults>
</compile_context>

<pallas_src>
import math

import jax
import jax.numpy as jnp
from jax.experimental import pallas as pl
from jax.experimental.pallas import tpu as pltpu


def _sincos_kernel(x_ref, w_ref, o_ref):
    """x_ref: (TB, 1), w_ref: (1, half_dim), o_ref: (TB, 2*half_dim)."""
    x = x_ref[...]                                  # (TB, 1)     f32
    w = w_ref[...]                                  # (1, half)   f32

    # freqs = x * (w * 2*pi): the 2*pi scale is folded into the single
    # (1, half_dim) row once, then broadcast against the column of x.
    freqs = x * (w * (2.0 * math.pi))               # (TB, half)  f32 (VPU)

    # sin/cos on the EUP, assembled as one even-width, lane-aligned slab
    # (sin at lane 0, cos at lane half_dim) and stored with a single
    # full-tile store. No odd-width masked partial stores.
    out = jnp.concatenate([jnp.sin(freqs), jnp.cos(freqs)], axis=-1)
    o_ref[...] = out.astype(o_ref.dtype)


def _round_up(n, m):
    return ((n + m - 1) // m) * m


def random_or_learned_sinusoidal_pos_emb(x, weights, *, block_rows=1024,
                                         out_dtype=jnp.float32):
    """x: (B,) timesteps, weights: (half_dim,) frequencies.

    Returns (B, 2*half_dim + 1) = concat([x, sin(freqs), cos(freqs)], -1),
    matching the PyTorch module.  Set out_dtype=jnp.bfloat16 if the consuming
    time-embedding MLP runs in bf16 (compute stays f32; cast only at store).
    """
    B = x.shape[0]
    half_dim = weights.shape[0]

    x_f32 = x.astype(jnp.float32)
    x_col = x_f32.reshape(B, 1)                       # (B, 1)
    w_row = weights.reshape(1, half_dim).astype(jnp.float32)

    # Row block: multiple of 8 (sublane), capped so per-block VMEM stays tiny
    # (input (TB,1) + output (TB, 2*half_dim) f32, double-buffered) — safe
    # within the scoped-VMEM defaults on v5e/v6e/v7x for any realistic half_dim.
    TB = min(block_rows, _round_up(B, 8))
    grid = (pl.cdiv(B, TB),)

    cost = pl.CostEstimate(
        flops=2 * B * half_dim,                       # the broadcast multiplies
        transcendentals=2 * B * half_dim,             # sin + cos
        bytes_accessed=4 * (B + half_dim + B * 2 * half_dim),
    )

    sincos = pl.pallas_call(
        _sincos_kernel,
        out_shape=jax.ShapeDtypeStruct((B, 2 * half_dim), out_dtype),
        grid=grid,
        in_specs=[
            pl.BlockSpec((TB, 1), lambda i: (i, 0)),          # x rows, blocked
            pl.BlockSpec((1, half_dim), lambda i: (0, 0)),    # weights, resident
        ],
        out_specs=pl.BlockSpec((TB, 2 * half_dim), lambda i: (i, 0)),
        compiler_params=pltpu.CompilerParams(
            dimension_semantics=("parallel",),
        ),
        cost_estimate=cost,
    )(x_col, w_row)

    # x passthrough column lives in the wrapper (cheap XLA concat) so the
    # kernel's store path stays even-width and lane-aligned.
    return jnp.concatenate([x_col.astype(out_dtype), sincos], axis=-1)


def reference_forward(x, weights):
    """Pure-JAX reference mirroring the PyTorch forward."""
    xc = x[:, None].astype(jnp.float32)
    freqs = xc * weights[None, :].astype(jnp.float32) * (2.0 * math.pi)
    return jnp.concatenate([xc, jnp.sin(freqs), jnp.cos(freqs)], axis=-1)


if __name__ == "__main__":
    key = jax.random.PRNGKey(0)
    k_x, k_w = jax.random.split(key)

    B = 8          # batch of timesteps
    dim = 32       # module `dim` (must be even)
    half_dim = dim // 2

    # timesteps in [0, 1), random sinusoidal frequencies ~ N(0, 1)
    x = jax.random.uniform(k_x, (B,), jnp.float32)
    weights = jax.random.normal(k_w, (half_dim,), jnp.float32)

    out = random_or_learned_sinusoidal_pos_emb(x, weights)
    out = jax.block_until_ready(out)

    ref = reference_forward(x, weights)
    assert out.shape == (B, dim + 1), out.shape
    err = float(jnp.max(jnp.abs(out - ref)))
    assert jnp.allclose(out, ref, atol=1e-5, rtol=1e-5), f"max abs err {err}"

    print("KERNEL_OK")
</pallas_src>

<mosaic_0001>
module attributes {stable_mosaic.version = 11 : i64} {
  func.func @_sincos_kernel(%arg0: i32, %arg1: memref<8x1xf32, #tpu.memory_space<vmem>>, %arg2: memref<1x16xf32, #tpu.memory_space<vmem>>, %arg3: memref<8x32xf32, #tpu.memory_space<vmem>>) attributes {dimension_semantics = [#tpu.dimension_semantics<parallel>], iteration_bounds = array<i64: 1>, scalar_prefetch = 0 : i64, scratch_operands = 0 : i64, tpu.core_type = #tpu.core_type<tc>, window_params = [{transform_indices = @transform_0, window_bounds = array<i64: 8, 1>}, {pipeline_mode = #tpu.pipeline_mode<synchronous>, transform_indices = @transform_1, window_bounds = array<i64: 1, 16>}, {transform_indices = @transform_2, window_bounds = array<i64: 8, 32>}]} {
    %c0 = arith.constant 0 : index
    %c0_0 = arith.constant 0 : index
    %0 = vector.load %arg1[%c0, %c0_0] : memref<8x1xf32, #tpu.memory_space<vmem>>, vector<8x1xf32>
    %c0_1 = arith.constant 0 : index
    %c0_2 = arith.constant 0 : index
    %1 = vector.load %arg2[%c0_1, %c0_2] : memref<1x16xf32, #tpu.memory_space<vmem>>, vector<1x16xf32>
    %cst = arith.constant 6.28318548 : f32
    %2 = vector.broadcast %cst : f32 to vector<1x16xf32>
    %3 = arith.mulf %1, %2 : vector<1x16xf32>
    %4 = vector.broadcast %0 : vector<8x1xf32> to vector<8x16xf32>
    %5 = vector.broadcast %3 : vector<1x16xf32> to vector<8x16xf32>
    %6 = arith.mulf %4, %5 : vector<8x16xf32>
    %7 = math.sin %6 : vector<8x16xf32>
    %8 = math.cos %6 : vector<8x16xf32>
    %9 = tpu.concatenate %7, %8 in 1 : vector<8x16xf32>, vector<8x16xf32> -> vector<8x32xf32>
    %c0_3 = arith.constant 0 : index
    %c0_4 = arith.constant 0 : index
    %10 = vector.load %arg3[%c0_3, %c0_4] : memref<8x32xf32, #tpu.memory_space<vmem>>, vector<8x32xf32>
    tpu.vector_store %arg3[%c0_3, %c0_4], %9 {strides = array<i32>} : memref<8x32xf32, #tpu.memory_space<vmem>>, vector<8x32xf32>,
    return
  }
  func.func @transform_0(%arg0: i32) -> (i32, i32) {
    %c0_i32 = arith.constant 0 : i32
    %c0_i32_0 = arith.constant 0 : i32
    return %arg0, %c0_i32 : i32, i32
  }
  func.func @transform_1(%arg0: i32) -> (i32, i32) {
    %c0_i32 = arith.constant 0 : i32
    %c0_i32_0 = arith.constant 0 : i32
    %c0_i32_1 = arith.constant 0 : i32
    return %c0_i32, %c0_i32_0 : i32, i32
  }
  func.func @transform_2(%arg0: i32) -> (i32, i32) {
    %c0_i32 = arith.constant 0 : i32
    %c0_i32_0 = arith.constant 0 : i32
    return %arg0, %c0_i32 : i32, i32
  }
}

</mosaic_0001>

<bundles_post_ra>
// kernel: tpu_custom_call.1
= control target key start
LH: loop header
LB: loop body
LE: loop exit
PB: predicated region body
PF: predicated region fallthrough
CT: control target
= control target key end

     0   :  { %v306_v1 = vmov 0   ;;  %s369_s0 = inlined_call_operand.vmem [shape: f32[8,1], index: 0, kind: input, shape index: {}]   ;;  %s370_s1 = inlined_call_operand.vmem [shape: f32[1,16], index: 1, kind: input, shape index: {}]   ;;  %s371_s2 = inlined_call_operand.hbm [shape: f32[8,32], index: 2, kind: output, shape index: {}]  }
   0x1   :  { %v12_v0 = vld [vmem:[%s369_s0] sm:$0xff]  ;;  %277 = vset.pattern.permute.xlu0 %v306_v1 }
   0x2   :  { %17 = vperm.xlu0 %277, %v12_v0  }
   0x3   :  { %7 = vsyncpa [#allocation3], 0  ;;  %v21_v2 = vlaneseq  ;;  %v13_v4 = vld [vmem:[%s370_s1] sm:$0x1]  ;;  %v307_v20 = vmov 683565275  }
   0x4   :  { %v14_v5 = vmul.f32 6.2831855, %v13_v4  ;;  %v308_v22 = vmov 2475754826   ;;  %v309_v25 = vmov 2131351028  }
   0x5   :  { %v22_v3 = vshrl.u32 %v21_v2, 7  ;;  %v310_v28 = vmov 2102212464   ;;  %v311_v31 = vmov 920167782   ;;  %s313_s0 = smov 16  }
   0x6   :  { %v312_v34 = vmov 1326507024   ;;  %s314_s1 = smov [#allocation2]  }
   0x7   :  { %v23_v6 = vsub.s32 0, %v22_v3  ;;  %s248_s13 = sshll.u32 %s314_s1, 4  ;;  %s249_s13 = int_to_ptr.vmem [resolvable:$true] %s248_s13 }
   0x8   :  { %s282_s14 = scalar_lea.vmem %s249_s13, 128  ;;  %p287_p1 = scmp.lt.s32.totalorder %s249_s13, %s249_s13 }
   0x9   :  { %v24_v7 = vrot.slane %v14_v5, %v23_v6  ;;  %p283_p0 = scmp.ne.s32.totalorder %s249_s13, %s282_s14  ;;  %p288_p2 = scmp.lt.s32.totalorder %s282_s14, %s282_s14 }
   0xb   :  { %p289_p3 = por %p288_p2, %p287_p1 }
   0xd   :  { %p290_p4 = pnand %p289_p3, %p283_p0 }
  0x81   :  { %v18_v8 = vpop.permute.xlu0 %17 }
  0x82   :  { %v336_v9 = vmul.f32 %v24_v7, %v18_v8 }
  0x84   :  { %v30_v10 = vand.u32 2139095040, %v336_v9  ;;  %v27_v14 = vand.u32 2147483647, %v336_v9  ;;  %vm29_vm7 = vcmp.lt.s32.totalorder %v336_v9, 0  ;;  %vm119_vm15 = vweird.f32 %v336_v9 }
  0x86   :  { %v31_v11 = vshrl.u32 %v30_v10, 23  ;;  %v34_v17 = vand.u32 8388607, %v27_v14  ;;  %vm28_vm8 = vcmp.le.f32.partialorder %v27_v14, 0.7853982 }
  0x88   :  { %v256_v12 = vadd.s32 4294967169, %v31_v11  ;;  %v35_v36 = vor.u32 8388608, %v34_v17 }
  0x8a   :  { %v37_v13 = vadd.s32 1, %v256_v12  ;;  %v75_v50 = vshll.u32 %v35_v36, 8 }
  0x8c   :  { %vm38_vm0 = vcmp.gt.s32.totalorder %v37_v13, 0 }
  0x8d   :  { %v39_v15 = vsel %vm38_vm0, %v37_v13, 0  ;;  %vm238_vm0 = vcmask 130048  }
  0x8e   :  { %v41_v16 = vand.u32 31, %v39_v15  ;;  %v40_v19 = vshrl.u32 %v39_v15, 5 }
  0x90   :  { %v42_v18 = vsub.s32 32, %v41_v16  ;;  %v44_v21 = vshll.u32 %v307_v20, %v41_v16  ;;  %v47_v23 = vshll.u32 %v308_v22, %v41_v16  ;;  %v50_v27 = vshll.u32 %v309_v25, %v41_v16 }
  0x91   :  { %v53_v30 = vshll.u32 %v310_v28, %v41_v16  ;;  %v56_v33 = vshll.u32 %v311_v31, %v41_v16  ;;  %vm59_vm1 = vcmp.lt.s32.totalorder %v40_v19, 1  ;;  %vm62_vm2 = vcmp.lt.s32.totalorder %v40_v19, 4 }
  0x92   :  { %v45_v24 = vshrl.u32 %v308_v22, %v42_v18  ;;  %v48_v26 = vshrl.u32 %v309_v25, %v42_v18  ;;  %v51_v29 = vshrl.u32 %v310_v28, %v42_v18  ;;  %v54_v32 = vshrl.u32 %v311_v31, %v42_v18 }
  0x93   :  { %v57_v35 = vshrl.u32 %v312_v34, %v42_v18  ;;  %v43_v45 = vshrl.u32 %v307_v20, %v42_v18  ;;  %vm61_vm3 = vcmp.lt.s32.totalorder %v40_v19, 3  ;;  %vm60_vm4 = vcmp.lt.s32.totalorder %v40_v19, 2 }
  0x94   :  { %v46_v37 = vor.u32 %v45_v24, %v44_v21  ;;  %v49_v38 = vor.u32 %v48_v26, %v47_v23  ;;  %v52_v39 = vor.u32 %v51_v29, %v50_v27  ;;  %v55_v40 = vor.u32 %v54_v32, %v53_v30 }
  0x95   :  { %v58_v41 = vor.u32 %v57_v35, %v56_v33 }
  0x96   :  { %v64_v42 = vsel %vm62_vm2, %v52_v39, 2102212464  ;;  %v67_v43 = vsel %vm59_vm1, %v46_v37, %v49_v38  ;;  %v71_v44 = vsel %vm59_vm1, %v49_v38, %v52_v39  ;;  %v68_v46 = vsel %vm62_vm2, %v55_v40, 920167782 }
  0x97   :  { %v72_v47 = vsel %vm62_vm2, %v58_v41, 1326507024  ;;  %v69_v48 = vsel %vm61_vm3, %v52_v39, %v68_v46  ;;  %v63_v51 = vsel %vm59_vm1, %v43_v45, %v46_v37  ;;  %v65_v52 = vsel %vm61_vm3, %v49_v38, %v64_v42 }
  0x98   :  { %v73_v49 = vsel %vm61_vm3, %v55_v40, %v72_v47  ;;  %v70_v53 = vsel %vm60_vm4, %v67_v43, %v69_v48  ;;  %v66_v59 = vsel %vm60_vm4, %v63_v51, %v65_v52  ;;  %vm240_vm1 = vcmask 261120  }
  0x99   :  { %v74_v54 = vsel %vm60_vm4, %v71_v44, %v73_v49  ;;  %v345_v57 = vmul.u32.u64.low %v75_v50, %v70_v53  ;;  %v346_v58 = vmul.u32.u64.high %v75_v50, %v70_v53, %v345_v57  ;;  %v82_v61 = vmul.u32 %v75_v50, %v66_v59 }
  0x9a   :  { %v342_v55 = vmul.u32.u64.low %v75_v50, %v74_v54  ;;  %v343_v56 = vmul.u32.u64.high %v75_v50, %v74_v54, %v342_v55 }
  0x9b   :  { %v85_v60 = vadd.s32 1, %v346_v58 }
  0x9c   :  { %vm84_vm5 = vc.u32 %v343_v56, %v345_v57  ;;  %v83_v10 = vadd.s32 %v345_v57, %v343_v56 }
  0x9d   :  { %v86_v62 = vsel %vm84_vm5, %v85_v60, %v346_v58 }
  0x9e   :  { %v87_v63 = vadd.s32 %v86_v62, %v82_v61 }
  0xa0   :  { %v88_v0 = vadd.s32 536870912, %v87_v63 }
  0xa2   :  { %v89_v1 = vshrl.u32 %v88_v0, 30 }
  0xa4   :  { %v90_v2 = vshll.u32 %v89_v1, 30  ;;  %v113_v23 = vsub.s32 4, %v89_v1 }
  0xa6   :  { %v91_v3 = vsub.s32 %v87_v63, %v90_v2  ;;  %v114_v26 = vsel %vm29_vm7, %v113_v23, %v89_v1 }
  0xa7   :  { %v116_v28 = vsel %vm28_vm8, 0, %v114_v26 }
  0xa8   :  { %v93_v4 = vsub.s32 0, %v91_v3  ;;  %v120_v29 = vadd.s32 3, %v116_v28  ;;  %v224_v31 = vand.u32 3, %v116_v28 }
  0xaa   :  { %v257_v5 = vmin.u32 %v93_v4, %v91_v3  ;;  %v121_v30 = vand.u32 3, %v120_v29  ;;  %vm229_vm10 = vcmp.eq.s32.totalorder %v224_v31, 2  ;;  %vm226_vm12 = vcmp.eq.s32.totalorder %v224_v31, 0 }
  0xab   :  { %vm225_vm14 = vcmp.lt.s32.totalorder %v224_v31, 2 }
  0xac   :  { %v95_v6 = vclz %v257_v5  ;;  %vm126_vm9 = vcmp.eq.s32.totalorder %v121_v30, 2  ;;  %vm123_vm11 = vcmp.eq.s32.totalorder %v121_v30, 0  ;;  %vm122_vm13 = vcmp.lt.s32.totalorder %v121_v30, 2 }
  0xae   :  { %v258_v7 = vadd.s32 4294967294, %v95_v6 }
  0xb0   :  { %vm259_vm6 = vcmp.lt.s32.totalorder %v258_v7, 0 }
  0xb1   :  { %v98_v8 = vsel %vm259_vm6, 0, %v258_v7 }
  0xb2   :  { %v99_v11 = vsub.s32 32, %v98_v8  ;;  %v103_v12 = vsub.s32 4294967266, %v98_v8  ;;  %v100_v13 = vshll.u32 %v91_v3, %v98_v8 }
  0xb4   :  { %v101_v15 = vshrl.u32 %v83_v10, %v99_v11  ;;  %v104_v16 = vadd.s32 127, %v103_v12 }
  0xb6   :  { %v102_v17 = vor.u32 %v101_v15, %v100_v13  ;;  %v105_v18 = vshll.u32 %v104_v16, 23 }
  0xb8   :  { %v106_v19 = vor.u32 4788187, %v105_v18  ;;  %v109_v21 = vcvt.s32.f32 %v102_v17 }
  0xba   :  { %v107_v20 = vand.u32 2147483647, %v106_v19 }
  0xbc   :  { %v110_v22 = vmul.f32 %v109_v21, %v107_v20 }
  0xbe   :  { %v111_v24 = vxor.u32 2147483648, %v110_v22 }
  0xc0   :  { %v112_v25 = vsel %vm29_vm7, %v111_v24, %v110_v22 }
  0xc1   :  { %v115_v27 = vsel %vm28_vm8, %v336_v9, %v112_v25 }
  0xc2   :  { %278 = vcosq.f32 %v115_v27 }
  0xc3   :  { %280 = vsinq.f32 %v115_v27 }
  0xcc   :  { %v279_v32 = vpop.eup %278 }
  0xcd   :  { %v281_v33 = vpop.eup %280  ;;  %v127_v34 = vxor.u32 2147483648, %v279_v32 }
  0xce   :  { %v124_v35 = vxor.u32 2147483648, %v281_v33 }
  0xcf   :  { %v231_v36 = vsel %vm229_vm10, %v127_v34, %v281_v33  ;;  %v128_v37 = vsel %vm126_vm9, %v127_v34, %v281_v33 }
  0xd0   :  { %v228_v14 = vsel %vm226_vm12, %v279_v32, %v124_v35  ;;  %v125_v38 = vsel %vm123_vm11, %v279_v32, %v124_v35 }
  0xd1   :  { %v232_v39 = vsel %vm225_vm14, %v228_v14, %v231_v36  ;;  %v129_v40 = vsel %vm122_vm13, %v125_v38, %v128_v37 }
  0xd2   :  { %v233_v41 = vsel %vm119_vm15, nan, %v232_v39  ;;  %v130_v42 = vsel %vm119_vm15, nan, %v129_v40 }
  0xd3   :  { %235 = vrot.lane.b32.xlu0 %v233_v41, %s313_s0 }
 0x145   :  { %v236_v43 = vpop.permute.xlu0 %235 }
 0x146   :  { %v239_v44 = vsel %vm238_vm0, %v130_v42, %v236_v43 }
 0x147   :  { %241 = vst.msk [vmem:[#allocation2] sm:$0xff] %vm240_vm1, %v239_v44 }
 0x148   :  { %293 = shalt.err (!%p290_p4)
}
 0x149   :  { %s294_s17 = scalar_lea.hbm %s371_s2, 128 }
 0x14a   :  { %p295_p5 = scmp.ne.s32.totalorder %s371_s2, %s294_s17  ;;  %p298_p6 = scmp.lt.u32.totalorder %s294_s17, %s371_s2 }
 0x14c   :  { %p300_p7 = pnand %p298_p6, %p295_p5 }
 0x14e   :  { %303 = shalt.err (!%p300_p7)
}
 0x14f   :  { %251 = dma.vmem_to_hbm [thread:$0]  %s249_s13, 128, %s371_s2, [#allocation3]  }
 0x150   :  { %304 = dma.done.wait [#allocation3], 128  }
 0x151   :  { %305 = vsyncadd [#allocation3], 4294967168 }
 0x152   :  { %255 = vsyncpa [#allocation3], 1 }

</bundles_post_ra>
